<compile_context>
chip_gen: v7x
topology: tpu7x:2x2x1
jax: 0.10.0
libtpu: 0.0.40
codegen_flags: <defaults>
</compile_context>

<pallas_src>
import functools

import jax
import jax.numpy as jnp
from jax.experimental import pallas as pl
from jax.experimental.pallas import tpu as pltpu

IGNORE_INDEX = 255
EPSILON = 1e-6
ALPHA = 0.5


def _round_up(x, m):
    return ((x + m - 1) // m) * m


def _choose_tile(C, HW, max_tile_lanes=None):
    """Pick a spatial tile (multiple of 128 lanes) and the padded HW extent."""
    # ~4 MiB of f32 pred per tile buffer (double-buffered by the pipeline).
    budget = (4 * 1024 * 1024) // (max(C, 1) * 4)
    budget = max(512, (budget // 128) * 128)
    if max_tile_lanes is not None:
        budget = max(128, (max_tile_lanes // 128) * 128)

    hw128 = _round_up(HW, 128)
    if hw128 <= budget:
        return hw128, hw128  # single tile per image

    # Prefer a tile that divides the lane-aligned extent (no extra padding).
    k = hw128 // 128
    best = 1
    d = 1
    while d * d <= k:
        if k % d == 0:
            for cand in (d, k // d):
                if cand * 128 <= budget:
                    best = max(best, cand)
        d += 1
    tile = best * 128
    if tile < min(1024, budget):
        # No reasonable divisor; fall back to a budget-sized tile + padding.
        tile = budget
        return tile, _round_up(HW, tile)
    return tile, hw128


def _loss_kernel(pred_ref, tgt_ref, dice_ref, ce_ref, *, hw, needs_mask):
    # pred_ref: (1, C, T) native dtype; tgt_ref: (1, 1, T) int32
    # dice_ref: (1, C, 3) f32 accumulator [inter | pred_sum | tgt_sum]
    # ce_ref:   (1, 1, 2) f32 accumulator [ce_sum | valid_count]
    t = pl.program_id(1)

    @pl.when(t == 0)
    def _():
        dice_ref[...] = jnp.zeros_like(dice_ref)
        ce_ref[...] = jnp.zeros_like(ce_ref)

    logits = pred_ref[0].astype(jnp.float32)        # (C, T)
    tgt = tgt_ref[0]                                # (1, T) int32
    C, T = logits.shape

    ch_iota = jax.lax.broadcasted_iota(jnp.int32, (C, T), 0)
    is_tgt = ch_iota == tgt                         # (C, T) bool, no f32 one-hot
    valid = (tgt != IGNORE_INDEX).astype(jnp.float32)  # (1, T)

    # Numerically stable softmax over the channel (sublane) axis.
    m = jnp.max(logits, axis=0, keepdims=True)      # (1, T)
    e = jnp.exp(logits - m)                         # (C, T)
    s = jnp.sum(e, axis=0, keepdims=True)           # (1, T)
    r = pl.reciprocal(s, approx=False)              # exact: loss matches ref to 1e-5
    softmax = e * r                                 # (C, T): mul, not divide

    # Cross-entropy per pixel: logsumexp - logit[target], masked by ignore_index.
    logit_t = jnp.sum(jnp.where(is_tgt, logits, 0.0), axis=0, keepdims=True)  # (1, T)
    ce_px = (jnp.log(s) + m - logit_t) * valid                                 # (1, T)

    # Dice partial sums (per class).  Only pred_sum needs an in-bounds mask for
    # spatial padding (padded targets are IGNORE_INDEX, so inter/tsum/CE are
    # already unaffected).
    inter = jnp.sum(jnp.where(is_tgt, softmax, 0.0), axis=1, keepdims=True)    # (C, 1)
    if needs_mask:
        lane_iota = jax.lax.broadcasted_iota(jnp.int32, (1, T), 1)
        inb = ((t * T + lane_iota) < hw).astype(jnp.float32)                   # (1, T)
        psum = jnp.sum(softmax * inb, axis=1, keepdims=True)                   # (C, 1)
    else:
        psum = jnp.sum(softmax, axis=1, keepdims=True)                         # (C, 1)
    tsum = jnp.sum(jnp.where(is_tgt, 1.0, 0.0), axis=1, keepdims=True)         # (C, 1)

    dice_ref[0] += jnp.concatenate([inter, psum, tsum], axis=1)                # (C, 3)

    ce_sum = jnp.sum(ce_px, axis=1, keepdims=True)                             # (1, 1)
    cnt = jnp.sum(valid, axis=1, keepdims=True)                                # (1, 1)
    ce_ref[0] += jnp.concatenate([ce_sum, cnt], axis=1)                        # (1, 2)


def combined_loss(pred, target, alpha=ALPHA, epsilon=EPSILON, max_tile_lanes=None):
    """pred: (N, C, H, W) float (f32 or bf16, NCHW); target: (N, H, W) int."""
    N, C, H, W = pred.shape
    HW = H * W
    tile, hw_pad = _choose_tile(C, HW, max_tile_lanes)
    num_tiles = hw_pad // tile

    pred_r = pred.reshape(N, C, HW)                  # keep native dtype (bf16 ok)
    if target.dtype != jnp.int32:
        target = target.astype(jnp.int32)
    tgt_r = target.reshape(N, 1, HW)

    needs_mask = hw_pad != HW
    if needs_mask:
        pad = hw_pad - HW
        pred_r = jnp.pad(pred_r, ((0, 0), (0, 0), (0, pad)))
        tgt_r = jnp.pad(tgt_r, ((0, 0), (0, 0), (0, pad)),
                        constant_values=IGNORE_INDEX)

    kernel = functools.partial(_loss_kernel, hw=HW, needs_mask=needs_mask)

    out_shapes = (
        jax.ShapeDtypeStruct((N, C, 3), jnp.float32),  # [inter | psum | tsum]
        jax.ShapeDtypeStruct((N, 1, 2), jnp.float32),  # [ce_sum | valid_count]
    )

    grid_spec = pltpu.PrefetchScalarGridSpec(
        num_scalar_prefetch=0,
        grid=(N, num_tiles),
        in_specs=[
            pl.BlockSpec((1, C, tile), lambda n, t: (n, 0, t)),
            pl.BlockSpec((1, 1, tile), lambda n, t: (n, 0, t)),
        ],
        out_specs=[
            pl.BlockSpec((1, C, 3), lambda n, t: (n, 0, 0)),
            pl.BlockSpec((1, 1, 2), lambda n, t: (n, 0, 0)),
        ],
    )

    dice_out, ce_out = pl.pallas_call(
        kernel,
        out_shape=out_shapes,
        grid_spec=grid_spec,
        compiler_params=pltpu.CompilerParams(
            dimension_semantics=("parallel", "arbitrary"),
            vmem_limit_bytes=32 * 1024 * 1024,
        ),
    )(pred_r, tgt_r)

    inter = dice_out[:, :, 0]   # (N, C)
    psum = dice_out[:, :, 1]    # (N, C)
    tsum = dice_out[:, :, 2]    # (N, C)

    # Dice loss
    dice_score = (2.0 * inter + epsilon) / (psum + tsum + epsilon)
    dice = 1.0 - jnp.mean(dice_score)

    # Cross-entropy (mean over non-ignored pixels, weight=None).
    # NOTE: if every pixel is IGNORE_INDEX this yields NaN, same as PyTorch.
    ce_loss = jnp.sum(ce_out[:, 0, 0]) / jnp.sum(ce_out[:, 0, 1])

    return alpha * dice + (1.0 - alpha) * ce_loss


def _reference_loss(pred, target, alpha=ALPHA, epsilon=EPSILON):
    """Pure-JAX reference mirroring the PyTorch forward (for sanity only)."""
    N, C, H, W = pred.shape
    pred = pred.astype(jnp.float32)
    onehot = jax.nn.one_hot(target, C, axis=1, dtype=jnp.float32)  # (N, C, H, W)
    sm = jax.nn.softmax(pred, axis=1)
    inter = jnp.sum(sm * onehot, axis=(2, 3))
    union = jnp.sum(sm, axis=(2, 3)) + jnp.sum(onehot, axis=(2, 3))
    dice = 1.0 - jnp.mean((2.0 * inter + epsilon) / (union + epsilon))
    logp = jax.nn.log_softmax(pred, axis=1)
    valid = (target != IGNORE_INDEX)
    nll = -jnp.sum(logp * onehot, axis=1) * valid
    ce = jnp.sum(nll) / jnp.sum(valid)
    return alpha * dice + (1.0 - alpha) * ce


if __name__ == "__main__":
    key = jax.random.PRNGKey(0)
    k1, k2, k3, k4 = jax.random.split(key, 4)

    # --- main small test (batch=2, channels=4, 16x16 spatial) ---
    N, C, H, W = 2, 4, 16, 16
    pred = jax.random.normal(k1, (N, C, H, W), dtype=jnp.float32)
    target = jax.random.randint(k2, (N, H, W), 0, C, dtype=jnp.int32)
    target = target.at[0, 0, :3].set(IGNORE_INDEX)  # exercise ignore_index in CE

    loss = combined_loss(pred, target)
    jax.block_until_ready(loss)
    ref = _reference_loss(pred, target)
    assert jnp.allclose(loss, ref, atol=1e-5, rtol=1e-5), (loss, ref)

    # --- multi-tile spatial reduction path (forces 2 HW tiles) ---
    loss_tiled = combined_loss(pred, target, max_tile_lanes=128)
    jax.block_until_ready(loss_tiled)
    assert jnp.allclose(loss_tiled, ref, atol=1e-5, rtol=1e-5), (loss_tiled, ref)

    # --- spatial padding path (HW=100 -> padded to 128 lanes) ---
    N2, C2, H2, W2 = 2, 4, 10, 10
    pred2 = jax.random.normal(k3, (N2, C2, H2, W2), dtype=jnp.float32)
    target2 = jax.random.randint(k4, (N2, H2, W2), 0, C2, dtype=jnp.int32)
    loss_pad = combined_loss(pred2, target2)
    jax.block_until_ready(loss_pad)
    ref_pad = _reference_loss(pred2, target2)
    assert jnp.allclose(loss_pad, ref_pad, atol=1e-5, rtol=1e-5), (loss_pad, ref_pad)

    print("KERNEL_OK")
</pallas_src>

<mosaic_0001>
module attributes {stable_mosaic.version = 11 : i64} {
  func.func @_loss_kernel(%arg0: i32, %arg1: i32, %arg2: memref<1x4x256xf32, #tpu.memory_space<vmem>>, %arg3: memref<1x1x256xi32, #tpu.memory_space<vmem>>, %arg4: memref<1x4x3xf32, #tpu.memory_space<vmem>>, %arg5: memref<1x1x2xf32, #tpu.memory_space<vmem>>) attributes {dimension_semantics = [#tpu.dimension_semantics<parallel>, #tpu.dimension_semantics<arbitrary>], iteration_bounds = array<i64: 2, 1>, scalar_prefetch = 0 : i64, scratch_operands = 0 : i64, tpu.core_type = #tpu.core_type<tc>, window_params = [{transform_indices = @transform_0, window_bounds = array<i64: 1, 4, 256>}, {transform_indices = @transform_1, window_bounds = array<i64: 1, 1, 256>}, {transform_indices = @transform_2, window_bounds = array<i64: 1, 4, 3>}, {transform_indices = @transform_3, window_bounds = array<i64: 1, 1, 2>}]} {
    %c0_i32 = arith.constant 0 : i32
    %0 = arith.cmpi eq, %arg1, %c0_i32 : i32
    %1 = arith.extui %0 : i1 to i32
    %c0_i32_0 = arith.constant 0 : i32
    %2 = arith.cmpi ne, %1, %c0_i32_0 : i32
    scf.if %2 {
      %cst_29 = arith.constant 0.000000e+00 : f32
      %61 = vector.broadcast %cst_29 : f32 to vector<1x4x3xf32>
      %c0_30 = arith.constant 0 : index
      %c0_31 = arith.constant 0 : index
      %c0_32 = arith.constant 0 : index
      %62 = vector.load %arg4[%c0_30, %c0_31, %c0_32] : memref<1x4x3xf32, #tpu.memory_space<vmem>>, vector<1x4x3xf32>
      tpu.vector_store %arg4[%c0_30, %c0_31, %c0_32], %61 {strides = array<i32>} : memref<1x4x3xf32, #tpu.memory_space<vmem>>, vector<1x4x3xf32>,
      %cst_33 = arith.constant 0.000000e+00 : f32
      %63 = vector.broadcast %cst_33 : f32 to vector<1x1x2xf32>
      %c0_34 = arith.constant 0 : index
      %c0_35 = arith.constant 0 : index
      %c0_36 = arith.constant 0 : index
      %64 = vector.load %arg5[%c0_34, %c0_35, %c0_36] : memref<1x1x2xf32, #tpu.memory_space<vmem>>, vector<1x1x2xf32>
      tpu.vector_store %arg5[%c0_34, %c0_35, %c0_36], %63 {strides = array<i32>} : memref<1x1x2xf32, #tpu.memory_space<vmem>>, vector<1x1x2xf32>,
    } else {
    }
    %c0 = arith.constant 0 : index
    %c0_1 = arith.constant 0 : index
    %c0_2 = arith.constant 0 : index
    %3 = vector.load %arg2[%c0, %c0_1, %c0_2] : memref<1x4x256xf32, #tpu.memory_space<vmem>>, vector<1x4x256xf32>
    %4 = vector.shape_cast %3 : vector<1x4x256xf32> to vector<4x256xf32>
    %c0_3 = arith.constant 0 : index
    %c0_4 = arith.constant 0 : index
    %c0_5 = arith.constant 0 : index
    %5 = vector.load %arg3[%c0_3, %c0_4, %c0_5] : memref<1x1x256xi32, #tpu.memory_space<vmem>>, vector<1x1x256xi32>
    %6 = vector.shape_cast %5 : vector<1x1x256xi32> to vector<1x256xi32>
    %7 = tpu.iota {dimensions = array<i32: 0>} : vector<4x256xi32>
    %8 = vector.broadcast %6 : vector<1x256xi32> to vector<4x256xi32>
    %9 = arith.cmpi eq, %7, %8 : vector<4x256xi32>
    %c255_i32 = arith.constant 255 : i32
    %10 = vector.broadcast %c255_i32 : i32 to vector<1x256xi32>
    %11 = arith.cmpi ne, %6, %10 : vector<1x256xi32>
    %12 = arith.extui %11 : vector<1x256xi1> to vector<1x256xi32>
    %13 = arith.sitofp %12 : vector<1x256xi32> to vector<1x256xf32>
    %cst = arith.constant dense<0xFF800000> : vector<256xf32>
    %14 = vector.multi_reduction <maximumf>, %4, %cst [0] : vector<4x256xf32> to vector<256xf32>
    %15 = vector.shape_cast %14 : vector<256xf32> to vector<1x256xf32>
    %16 = vector.broadcast %15 : vector<1x256xf32> to vector<4x256xf32>
    %17 = arith.subf %4, %16 : vector<4x256xf32>
    %18 = math.exp %17 : vector<4x256xf32>
    %cst_6 = arith.constant dense<0.000000e+00> : vector<256xf32>
    %19 = vector.multi_reduction <add>, %18, %cst_6 [0] : vector<4x256xf32> to vector<256xf32>
    %20 = vector.shape_cast %19 : vector<256xf32> to vector<1x256xf32>
    %21 = tpu.reciprocal %20 : vector<1x256xf32> -> vector<1x256xf32>
    %22 = vector.broadcast %21 : vector<1x256xf32> to vector<4x256xf32>
    %23 = arith.mulf %18, %22 : vector<4x256xf32>
    %cst_7 = arith.constant 0.000000e+00 : f32
    %24 = vector.broadcast %cst_7 : f32 to vector<4x256xf32>
    %25 = arith.select %9, %4, %24 : vector<4x256xi1>, vector<4x256xf32>
    %cst_8 = arith.constant dense<0.000000e+00> : vector<256xf32>
    %26 = vector.multi_reduction <add>, %25, %cst_8 [0] : vector<4x256xf32> to vector<256xf32>
    %27 = vector.shape_cast %26 : vector<256xf32> to vector<1x256xf32>
    %28 = math.log %20 : vector<1x256xf32>
    %29 = arith.addf %28, %15 : vector<1x256xf32>
    %30 = arith.subf %29, %27 : vector<1x256xf32>
    %31 = arith.mulf %30, %13 : vector<1x256xf32>
    %cst_9 = arith.constant 0.000000e+00 : f32
    %32 = vector.broadcast %cst_9 : f32 to vector<4x256xf32>
    %33 = arith.select %9, %23, %32 : vector<4x256xi1>, vector<4x256xf32>
    %cst_10 = arith.constant dense<0.000000e+00> : vector<4xf32>
    %34 = vector.multi_reduction <add>, %33, %cst_10 [1] : vector<4x256xf32> to vector<4xf32>
    %35 = vector.shape_cast %34 : vector<4xf32> to vector<4x1xf32>
    %cst_11 = arith.constant dense<0.000000e+00> : vector<4xf32>
    %36 = vector.multi_reduction <add>, %23, %cst_11 [1] : vector<4x256xf32> to vector<4xf32>
    %37 = vector.shape_cast %36 : vector<4xf32> to vector<4x1xf32>
    %cst_12 = arith.constant 1.000000e+00 : f32
    %cst_13 = arith.constant 0.000000e+00 : f32
    %38 = vector.broadcast %cst_12 : f32 to vector<4x256xf32>
    %39 = vector.broadcast %cst_13 : f32 to vector<4x256xf32>
    %40 = arith.select %9, %38, %39 : vector<4x256xi1>, vector<4x256xf32>
    %cst_14 = arith.constant dense<0.000000e+00> : vector<4xf32>
    %41 = vector.multi_reduction <add>, %40, %cst_14 [1] : vector<4x256xf32> to vector<4xf32>
    %42 = vector.shape_cast %41 : vector<4xf32> to vector<4x1xf32>
    %c0_15 = arith.constant 0 : index
    %c0_16 = arith.constant 0 : index
    %c0_17 = arith.constant 0 : index
    %43 = vector.load %arg4[%c0_15, %c0_16, %c0_17] : memref<1x4x3xf32, #tpu.memory_space<vmem>>, vector<1x4x3xf32>
    %44 = vector.shape_cast %43 : vector<1x4x3xf32> to vector<4x3xf32>
    %45 = tpu.concatenate %35, %37, %42 in 1 : vector<4x1xf32>, vector<4x1xf32>, vector<4x1xf32> -> vector<4x3xf32>
    %46 = arith.addf %44, %45 : vector<4x3xf32>
    %c0_18 = arith.constant 0 : index
    %c0_19 = arith.constant 0 : index
    %c0_20 = arith.constant 0 : index
    %47 = vector.load %arg4[%c0_18, %c0_19, %c0_20] : memref<1x4x3xf32, #tpu.memory_space<vmem>>, vector<1x4x3xf32>
    %48 = vector.shape_cast %47 : vector<1x4x3xf32> to vector<4x3xf32>
    %49 = vector.shape_cast %46 : vector<4x3xf32> to vector<1x4x3xf32>
    tpu.vector_store %arg4[%c0_18, %c0_19, %c0_20], %49 {strides = array<i32>} : memref<1x4x3xf32, #tpu.memory_space<vmem>>, vector<1x4x3xf32>,
    %cst_21 = arith.constant dense<0.000000e+00> : vector<1xf32>
    %50 = vector.multi_reduction <add>, %31, %cst_21 [1] : vector<1x256xf32> to vector<1xf32>
    %51 = vector.shape_cast %50 : vector<1xf32> to vector<1x1xf32>
    %cst_22 = arith.constant dense<0.000000e+00> : vector<1xf32>
    %52 = vector.multi_reduction <add>, %13, %cst_22 [1] : vector<1x256xf32> to vector<1xf32>
    %53 = vector.shape_cast %52 : vector<1xf32> to vector<1x1xf32>
    %c0_23 = arith.constant 0 : index
    %c0_24 = arith.constant 0 : index
    %c0_25 = arith.constant 0 : index
    %54 = vector.load %arg5[%c0_23, %c0_24, %c0_25] : memref<1x1x2xf32, #tpu.memory_space<vmem>>, vector<1x1x2xf32>
    %55 = vector.shape_cast %54 : vector<1x1x2xf32> to vector<1x2xf32>
    %56 = tpu.concatenate %51, %53 in 1 : vector<1x1xf32>, vector<1x1xf32> -> vector<1x2xf32>
    %57 = arith.addf %55, %56 : vector<1x2xf32>
    %c0_26 = arith.constant 0 : index
    %c0_27 = arith.constant 0 : index
    %c0_28 = arith.constant 0 : index
    %58 = vector.load %arg5[%c0_26, %c0_27, %c0_28] : memref<1x1x2xf32, #tpu.memory_space<vmem>>, vector<1x1x2xf32>
    %59 = vector.shape_cast %58 : vector<1x1x2xf32> to vector<1x2xf32>
    %60 = vector.shape_cast %57 : vector<1x2xf32> to vector<1x1x2xf32>
    tpu.vector_store %arg5[%c0_26, %c0_27, %c0_28], %60 {strides = array<i32>} : memref<1x1x2xf32, #tpu.memory_space<vmem>>, vector<1x1x2xf32>,
    return
  }
  func.func @transform_0(%arg0: i32, %arg1: i32) -> (i32, i32, i32) {
    %c0_i32 = arith.constant 0 : i32
    %c0_i32_0 = arith.constant 0 : i32
    return %arg0, %c0_i32, %arg1 : i32, i32, i32
  }
  func.func @transform_1(%arg0: i32, %arg1: i32) -> (i32, i32, i32) {
    %c0_i32 = arith.constant 0 : i32
    %c0_i32_0 = arith.constant 0 : i32
    return %arg0, %c0_i32, %arg1 : i32, i32, i32
  }
  func.func @transform_2(%arg0: i32, %arg1: i32) -> (i32, i32, i32) {
    %c0_i32 = arith.constant 0 : i32
    %c0_i32_0 = arith.constant 0 : i32
    %c0_i32_1 = arith.constant 0 : i32
    return %arg0, %c0_i32, %c0_i32_0 : i32, i32, i32
  }
  func.func @transform_3(%arg0: i32, %arg1: i32) -> (i32, i32, i32) {
    %c0_i32 = arith.constant 0 : i32
    %c0_i32_0 = arith.constant 0 : i32
    %c0_i32_1 = arith.constant 0 : i32
    return %arg0, %c0_i32, %c0_i32_0 : i32, i32, i32
  }
}

</mosaic_0001>

<bundles_post_ra>
// kernel: tpu_custom_call.1
= control target key start
LH: loop header
LB: loop body
LE: loop exit
PB: predicated region body
PF: predicated region fallthrough
CT: control target
= control target key end

     0   :  { %9 = vsyncpa [#allocation3], 0  ;;  %s1103_s0 = inlined_call_operand.hbm [shape: f32[2,4,256], index: 0, kind: input, shape index: {}]   ;;  %s1104_s1 = inlined_call_operand.hbm [shape: s32[2,1,256], index: 1, kind: input, shape index: {}]   ;;  %s1105_s2 = inlined_call_operand.vmem [shape: f32[2,4,3], index: 2, kind: output, shape index: {0}]   ;;  %s1106_s3 = inlined_call_operand.hbm [shape: f32[2,1,2], index: 3, kind: output, shape index: {1}]  }
   0x1   :  { %11 = vsyncpa [#allocation3 + $0x1], 0 }
   0x2   :  { %12 = vsyncpa [#allocation6], 0 }
   0x3   :  { %14 = vsyncpa [#allocation6 + $0x1], 0 }
   0x4   :  { %15 = vsyncpa [#allocation4], 0 }
   0x5   :  { %17 = vsyncpa [#allocation4 + $0x1], 0  ;;  %s832_s12 = smov 0   ;;  %s834_s13 = smov 0  }
   0x6   :  { %s836_s14 = smov 0   ;;  %s838_s15 = smov 0  }
   0x7   :  { %s840_s16 = smov 0   ;;  %s842_s17 = smov 0  }
   0x8 LB: > { %s561_s18 = sadd.s32 4294967295, %s806_s17   ;;  %s562_s19 = sadd.s32 4294967294, %s806_s17   ;;  %s806_s17 = sphi %s842_s17, %s23_s17   ;;  %s802_s16 = sphi %s840_s16, %s1126_s16   ;;  %s798_s15 = sphi %s838_s15, %s1125_s15   ;;  %s794_s14 = sphi %s836_s14, %s1124_s14   ;;  %s790_s13 = sphi %s834_s13, %s1123_s13   ;;  %s786_s12 = sphi %s832_s12, %s1122_s12  }
   0x9   : > { %s35_s20 = sadd.s32 1, %s802_s16  ;;  %s44_s21 = sadd.s32 1, %s794_s14 }
   0xa   : > { %p37_p0 = scmp.ge.s32.totalorder %s35_s20, 2  ;;  %p51_p1 = scmp.ne.s32.totalorder %s794_s14, %s790_s13 }
   0xb   : > { %p52_p2 = scmp.eq.s32.totalorder %s806_s17, 0  ;;  %p57_p3 = scmp.ne.s32.totalorder %s790_s13, %s786_s12 }
   0xc   : > { %s1128_s20 = smov (%p37_p0, %s35_s20), 0  ;;  %p58_p5 = scmp.eq.s32.totalorder %s561_s18, 0 }
   0xd   : > { %p873_p4 = por %p52_p2, %p51_p1  ;;  %s39_s23 = ssub.s32 %s802_s16, %s1128_s20 }
   0xe   : > { %p135_p6 = scmp.eq.s32.totalorder %s561_s18, 1  ;;  %p42_p7 = scmp.eq.s32.totalorder %s39_s23, 0 }
   0xf   : > { %p879_p8 = por %p58_p5, %p57_p3  ;;  %p141_p10 = scmp.eq.s32.totalorder %s562_s19, 1 }
  0x10   : > { %p883_p9 = por %p135_p6, %p51_p1  ;;  %p598_p13 = scmp.lt.s32.totalorder %s806_s17, 2 }
  0x11   : > { %s1110_s24 = scalar_select %p879_p8, 1, 0 }
  0x12   : > { %s1111_s25 = scalar_select %p883_p9, 1, 0 }
  0x13   : > { %s888_s26 = scalar_select %p42_p7, %s794_s14, %s44_s21  }
  0x14   : > { %p890_p11 = por %p141_p10, %p57_p3  ;;  %s897_s28 = sand.u32 1, %s794_s14  }
  0x15   : > { %s565_s29 = sshll.u32 %s897_s28, 3  ;;  %s579_s30 = sshll.u32 %s802_s16, 7 }
  0x16   : > { %s1112_s27 = scalar_select %p890_p11, 1, 0 }
  0x17   : > { %s904_s6 = scalar_lea.hbm %s1103_s0, %s579_s30  ;;  %s165_s7 = scalar_lea.vmem [#allocation2], %s565_s29 }
  0x18   : > { %s175_s8 = sshll.u32 %s165_s7, 4  ;;  %p910_p0 = pnand %p598_p13, %p873_p4  ;;  %s906_s8 = int_to_ptr.vmem [resolvable:$true] %s175_s8 }
  0x19   : > { %s162_s10 = scalar_lea.sflag [#allocation3], %s897_s28  ;;  %s660_s11 = scalar_lea.hbm %s904_s6, 128 }
  0x1a   : > { %p661_p3 = scmp.ne.s32.totalorder %s904_s6, %s660_s11  ;;  %p662_p5 = pneg %p910_p0 }
  0x1b   : > { %s665_s21 = scalar_lea.hbm %s1103_s0, 256  ;;  %p666_p4 = scmp.lt.u32.totalorder %s904_s6, %s1103_s0 }
  0x1c   : > { %p663_p6 = pnand %p662_p5, %p661_p3  ;;  %p667_p10 = scmp.lt.u32.totalorder %s665_s21, %s660_s11 }
  0x1d   : > { %p669_p12 = scmp.lt.u32.totalorder %s660_s11, %s904_s6 }
  0x1e   : > { %p664_p7 = pneg %p663_p6  ;;  %p668_p13 = por %p667_p10, %p666_p4 }
  0x20   : > { %p670_p1 = por %p669_p12, %p668_p13 }
  0x22   : > { %p671_p2 = pnand %p670_p1, %p664_p7 }
  0x24   : > { %674 = shalt.err (!%p671_p2)
}
  0x25   : > { %s675_s29 = scalar_lea.vmem %s906_s8, 128  ;;  %s808_s30 = smov [#allocation2]  }
  0x26   : > { %p676_p3 = scmp.ne.s32.totalorder %s906_s8, %s675_s29  ;;  %s680_s4 = sshll.u32 %s808_s30, 4  ;;  %s681_s4 = int_to_ptr.vmem [resolvable:$false] %s680_s4 }
  0x27   : > { %s682_s5 = scalar_lea.vmem %s681_s4, 256  ;;  %p683_p9 = scmp.lt.s32.totalorder %s906_s8, %s681_s4 }
  0x28   : > { %p678_p6 = pnand %p676_p3, %p662_p5  ;;  %p684_p4 = scmp.lt.s32.totalorder %s682_s5, %s675_s29 }
  0x2a   : > { %p679_p11 = pneg %p678_p6  ;;  %p685_p10 = por %p684_p4, %p683_p9 }
  0x2c   : > { %p686_p12 = pnand %p685_p10, %p679_p11 }
  0x2e   : > { %689 = shalt.err (!%p686_p12)
}
  0x2f   : > { %590 = dma.hbm_to_vmem [thread:$0]  (!%p910_p0), %s904_s6, 128, %s906_s8, %s162_s10  }
  0x30   : > { %p1114_p1 = scmp.lt.s32.totalorder %s806_s17, 3  ;;  %p1115_p2 = scmp.ge.s32.totalorder %s806_s17, 1 }
  0x31   : > { %s568_s11 = sshll.u32 %s897_s28, 1  ;;  %s580_s18 = sshll.u32 %s802_s16, 5 }
  0x32   : > { %p946_p7 = pnand %p1115_p2, %p1114_p1  ;;  %s955_s22 = scalar_lea.hbm %s1104_s1, %s580_s18 }
  0x33   : > { %s186_s23 = scalar_lea.vmem [#allocation5], %s568_s11  ;;  %s183_s6 = scalar_lea.sflag [#allocation6], %s897_s28 }
  0x34   : > { %s1116_s7 = scalar_select %p946_p7, 1, 0 }
  0x35   : > { %s196_s29 = sshll.u32 %s186_s23, 4  ;;  %s690_s8 = scalar_lea.hbm %s955_s22, 32  ;;  %s197_s29 = int_to_ptr.vmem [resolvable:$true] %s196_s29 }
  0x36   : > { %p691_p9 = scmp.ne.s32.totalorder %s955_s22, %s690_s8  ;;  %s695_s4 = scalar_lea.hbm %s1104_s1, 64 }
  0x37   : > { %p696_p3 = scmp.lt.u32.totalorder %s955_s22, %s1104_s1  ;;  %p697_p6 = scmp.lt.u32.totalorder %s695_s4, %s690_s8 }
  0x38   : > { %p693_p11 = pnand %p691_p9, %p662_p5  ;;  %p699_p10 = scmp.lt.u32.totalorder %s690_s8, %s955_s22 }
  0x39   : > { %p698_p4 = por %p697_p6, %p696_p3 }
  0x3a   : > { %p694_p13 = pneg %p693_p11 }
  0x3b   : > { %p700_p12 = por %p699_p10, %p698_p4 }
  0x3d   : > { %p701_p1 = pnand %p700_p12, %p694_p13 }
  0x3f   : > { %704 = shalt.err (!%p701_p1)
}
  0x40   : > { %s705_s28 = scalar_lea.vmem %s197_s29, 32  ;;  %s809_s11 = smov [#allocation5]  }
  0x41   : > { %p706_p2 = scmp.ne.s32.totalorder %s197_s29, %s705_s28  ;;  %s710_s19 = sshll.u32 %s809_s11, 4  ;;  %s711_s19 = int_to_ptr.vmem [resolvable:$false] %s710_s19 }
  0x42   : > { %s712_s21 = scalar_lea.vmem %s711_s19, 64  ;;  %p713_p8 = scmp.lt.s32.totalorder %s197_s29, %s711_s19 }
  0x43   : > { %p708_p9 = pnand %p706_p2, %p662_p5  ;;  %p714_p7 = scmp.lt.s32.totalorder %s712_s21, %s705_s28 }
  0x45   : > { %p709_p11 = pneg %p708_p9  ;;  %p715_p3 = por %p714_p7, %p713_p8 }
  0x47   : > { %p716_p6 = pnand %p715_p3, %p709_p11 }
  0x49   : > { %719 = shalt.err (!%p716_p6)
}
  0x4a   : > { %593 = dma.hbm_to_vmem [thread:$0]  (!%p910_p0), %s955_s22, 32, %s197_s29, %s183_s6  }
  0x4b   : > { %p1117_p13 = scmp.ne.s32.totalorder %s1116_s7, 0 }
  0x4c   : > { %s980_s23 = sand.u32 (!%p1117_p13), 1, %s790_s13   ;;  %p1118_p5 = scmp.ne.s32.totalorder (!%p1117_p13), %s1110_s24, 0 }
  0x4d   : > { %205 = sbr.rel (%p1117_p13) target bundleno = 323 (0x143), region = 28  ;;  %s572_s8 = sshll.u32 (!%p1117_p13), %s980_s23, 3 }
  0x4e   : > { %s208_s10 = scalar_lea.sflag (!%p1117_p13), [#allocation3], %s980_s23  ;;  %s211_s30 = scalar_lea.vmem (!%p1117_p13), [#allocation2], %s572_s8 }
  0x54   : > { %773 = dma.done.wait (%p1118_p5), %s208_s10, 128  }
  0x55   : > { %775 = vsyncadd (%p1118_p5), %s208_s10, 4294967168  ;;  %s573_s9 = sshll.u32 %s980_s23, 1  ;;  %s217_s7 = scalar_lea.sflag [#allocation6], %s980_s23 }
  0x56   : > { %s220_s22 = scalar_lea.vmem [#allocation5], %s573_s9 }
  0x57   : > { %777 = dma.done.wait (%p1118_p5), %s217_s7, 32  }
  0x58   : > { %779 = vsyncadd (%p1118_p5), %s217_s7, 4294967264  ;;  %vm285_vm0 = vcmask 1043456   ;;  %v265_v0 = vld [vmem:[%s211_s30] sm:$0xff]  ;;  %v267_v15 = vlaneseq  ;;  %v266_v22 = vld [vmem:[%s220_s22] sm:$0x3]  ;;  %v810_v58 = vmov 0.0  }
  0x59   : > { %v283_v1 = vcombine.high %v265_v0, %v265_v0  ;;  %v286_v2 = vsel %vm285_vm0, %v265_v0, -inf  ;;  %vm279_vm3 = vcmp.ne.s32.totalorder %v266_v22, 255  ;;  %vm398_vm4 = vcmask 1040384   ;;  %p253_p8 = scmp.lt.s32.totalorder %s798_s15, 1  ;;  %s250_s29 = scalar_lea.vmem [#allocation7], %s980_s23 }
  0x5a   : > { %v287_v3 = vrot.slane %v286_v2, 4  ;;  %v996_v18 = vshrl.u32 %v267_v15, 7  ;;  %v575_v59 = vsel %vm279_vm3, 1.0, %v810_v58  ;;  %vm263_vm5 = vcmask 8192   ;;  %s576_s28 = sshll.u32 %s798_s15, 4  ;;  %s434_s11 = sshll.u32 %s250_s29, 4  ;;  %s1054_s11 = int_to_ptr.vmem [resolvable:$true] %s434_s11 }
  0x5b   : > { %v293_v4 = vsel %vm285_vm0, %v283_v1, -inf  ;;  %s254_s24 = scalar_select %p253_p8, %s798_s15, 1  ;;  %264 = vst.msk [vmem:[%s250_s29] sm:$0x1] %vm263_vm5, %v810_v58  ;;  %vm261_vm6 = vcmask 19456   ;;  %vm391_vm7 = vcmask 7168  }
  0x5c   : > { %v288_v5 = vmax.f32 %v286_v2, %v287_v3  ;;  %v294_v6 = vrot.slane %v293_v4, 4  ;;  %v271_v21 = vsub.s32 0, %v996_v18  ;;  %v275_v23 = vsub.s32 1, %v996_v18  ;;  %s1052_s8 = scalar_lea.hbm %s1106_s3, %s576_s28  ;;  %s419_s15 = scalar_lea.sflag [#allocation4], %s980_s23 }
  0x5d   : > { %s574_s6 = sshll.u32 %s254_s24, 2  ;;  %vm393_vm8 = vcmask 15360   ;;  %s720_s10 = scalar_lea.vmem %s1054_s11, 16 }
  0x5e   : > { %v289_v7 = vrot.slane %v288_v5, 2  ;;  %v295_v8 = vmax.f32 %v293_v4, %v294_v6  ;;  %v1000_v24 = vrot.slane %v266_v22, %v271_v21  ;;  %v1002_v25 = vrot.slane %v266_v22, %v275_v23  ;;  %s256_s18 = scalar_lea.vmem %s1105_s2, %s574_s6  ;;  %p721_p0 = scmp.ne.s32.totalorder %s1054_s11, %s720_s10 }
  0x5f   : > { %v359_v4 = vrot.slane %v575_v59, %v271_v21  ;;  %262 = vst.msk [vmem:[%s256_s18] sm:$0xf] %vm261_vm6, %v810_v58  ;;  %p1119_p7 = scmp.ne.s32.totalorder %s1111_s25, 0  ;;  %s811_s30 = smov [#allocation7]  }
  0x60   : > { %v290_v9 = vmax.f32 %v288_v5, %v289_v7  ;;  %v296_v10 = vrot.slane %v295_v8, 2  ;;  %vm277_vm1 = vcmp.eq.s32.totalorder %v996_v18, %v1000_v24  ;;  %vm278_vm2 = vcmp.eq.s32.totalorder %v996_v18, %v1002_v25  ;;  %s724_s9 = sshll.u32 %s811_s30, 4  ;;  %s725_s9 = int_to_ptr.vmem [resolvable:$false] %s724_s9 }
  0x61   : > { %v331_v27 = vsel %vm277_vm1, %v265_v0, 0.0  ;;  %v332_v31 = vsel %vm278_vm2, %v283_v1, 0.0  ;;  %v383_v15 = vsel %vm277_vm1, 1.0, %v810_v58  ;;  %p722_p4 = pnand %p721_p0, %p1119_p7  ;;  %s726_s7 = scalar_lea.vmem %s725_s9, 32 }
  0x62   : > { %v291_v11 = vrot.slane %v290_v9, 1  ;;  %v297_v12 = vmax.f32 %v295_v8, %v296_v10  ;;  %v333_v33 = vsel %vm285_vm0, %v331_v27, 0.0  ;;  %v340_v36 = vsel %vm285_vm0, %v332_v31, 0.0  ;;  %p727_p12 = scmp.lt.s32.totalorder %s1054_s11, %s725_s9  ;;  %p728_p1 = scmp.lt.s32.totalorder %s726_s7, %s720_s10 }
  0x63   : > { %v334_v39 = vrot.slane %v333_v33, 4  ;;  %v341_v42 = vrot.slane %v340_v36, 4  ;;  %v363_v8 = vrot.slane %v575_v59, %v275_v23  ;;  %v404_v27 = vsel %vm398_vm4, %v359_v4, 0.0  ;;  %p723_p10 = pneg %p722_p4 }
  0x64   : > { %v292_v13 = vmax.f32 %v290_v9, %v291_v11  ;;  %v298_v14 = vrot.slane %v297_v12, 1  ;;  %v385_v18 = vsel %vm285_vm0, %v383_v15, 0.0  ;;  %p729_p2 = por %p728_p1, %p727_p12 }
  0x65   : > { %v335_v45 = vadd.f32 %v334_v39, %v333_v33  ;;  %v342_v48 = vadd.f32 %v341_v42, %v340_v36 }
  0x66   : > { %v299_v16 = vmax.f32 %v297_v12, %v298_v14  ;;  %p730_p9 = pnand %p729_p2, %p723_p10 }
  0x67   : > { %v336_v50 = vrot.slane %v335_v45, 2  ;;  %v343_v51 = vrot.slane %v342_v48, 2 }
  0x68   : > { %v302_v17 = vcombine.low %v292_v13, %v299_v16 }
  0x69   : > { %v337_v52 = vadd.f32 %v336_v50, %v335_v45  ;;  %v344_v53 = vadd.f32 %v343_v51, %v342_v48 }
  0x6a   : > { %v304_v19 = vsub.f32 %v265_v0, %v302_v17 }
  0x6b   : > { %v338_v54 = vrot.slane %v337_v52, 1  ;;  %v345_v56 = vrot.slane %v344_v53, 1 }
  0x6c   : > { %v305_v20 = vmul.f32 1.442695, %v304_v19  ;;  %v384_v19 = vsel %vm278_vm2, 1.0, %v810_v58 }
  0x6d   : > { %v339_v61 = vadd.f32 %v338_v54, %v337_v52  ;;  %v346_v1 = vadd.f32 %v345_v56, %v344_v53  ;;  %v386_v25 = vsel %vm285_vm0, %v384_v19, 0.0 }
  0x6e   : > { %650 = vpow2.f32 %v305_v20  ;;  %v387_v31 = vadd.f32 %v386_v25, %v385_v18 }
  0x78   : > { %v651_v26 = vpop.eup %650 }
  0x79   : > { %v308_v28 = vcombine.high %v651_v26, %v651_v26  ;;  %v310_v29 = vsel %vm285_vm0, %v651_v26, 0.0 }
  0x7a   : > { %v311_v30 = vrot.slane %v310_v29, 4 }
  0x7b   : > { %v317_v32 = vsel %vm285_vm0, %v308_v28, 0.0  ;;  %v405_v28 = vsel %vm398_vm4, %v363_v8, 0.0 }
  0x7c   : > { %v312_v34 = vadd.f32 %v311_v30, %v310_v29  ;;  %v318_v35 = vrot.slane %v317_v32, 4  ;;  %v406_v30 = vadd.f32 %v405_v28, %v404_v27 }
  0x7e   : > { %v313_v37 = vrot.slane %v312_v34, 2  ;;  %v319_v38 = vadd.f32 %v318_v35, %v317_v32  ;;  %v409_v35 = vld [vmem:[%s250_s29] sm:$0x1] }
  0x80   : > { %v314_v40 = vadd.f32 %v313_v37, %v312_v34  ;;  %v320_v41 = vrot.slane %v319_v38, 2  ;;  %v390_v37 = vld [vmem:[%s256_s18] sm:$0xf] }
  0x82   : > { %v315_v43 = vrot.slane %v314_v40, 1  ;;  %v321_v44 = vadd.f32 %v320_v41, %v319_v38 }
  0x84   : > { %v316_v46 = vadd.f32 %v315_v43, %v314_v40  ;;  %v322_v47 = vrot.slane %v321_v44, 1 }
  0x86   : > { %v323_v49 = vadd.f32 %v322_v47, %v321_v44  ;;  %652 = vrcp.f32 %v316_v46 }
  0x87   : > { %654 = vlog2.f32 %v316_v46 }
  0x88   : > { %656 = vrcp.f32 %v323_v49 }
  0x89   : > { %658 = vlog2.f32 %v323_v49 }
  0x90   : > { %v653_v55 = vpop.eup %652 }
  0x91   : > { %v655_v57 = vpop.eup %654 }
  0x92   : > { %v657_v60 = vpop.eup %656  ;;  %v348_v62 = vmul.f32 0.6931472, %v655_v57 }
  0x93   : > { %v659_v63 = vpop.eup %658  ;;  %v328_v0 = vcombine.low %v653_v55, %v657_v60 }
  0x94   : > { %v350_v2 = vmul.f32 0.6931472, %v659_v63  ;;  %v351_v3 = vadd.f32 %v348_v62, %v292_v13 }
  0x95   : > { %v330_v5 = vmul.f32 %v651_v26, %v328_v0 }
  0x96   : > { %v352_v6 = vadd.f32 %v350_v2, %v299_v16  ;;  %v353_v7 = vsub.f32 %v351_v3, %v339_v61 }
  0x97   : > { %v369_v9 = vcombine.high %v330_v5, %v330_v5  ;;  %v378_v10 = vsel %vm285_vm0, %v330_v5, 0.0  ;;  %v371_v11 = vsel %vm277_vm1, %v330_v5, 0.0 }
  0x98   : > { %v354_v12 = vsub.f32 %v352_v6, %v346_v1  ;;  %v366_v14 = vmul.f32 %v359_v4, %v353_v7  ;;  %v373_v17 = vsel %vm285_vm0, %v371_v11, 0.0 }
  0x99   : > { %v379_v13 = vsel %vm285_vm0, %v369_v9, 0.0  ;;  %v372_v16 = vsel %vm278_vm2, %v369_v9, 0.0 }
  0x9a   : > { %v380_v20 = vadd.f32 %v379_v13, %v378_v10  ;;  %v367_v21 = vmul.f32 %v363_v8, %v354_v12  ;;  %v399_v22 = vsel %vm398_vm4, %v366_v14, 0.0  ;;  %v374_v23 = vsel %vm285_vm0, %v372_v16, 0.0 }
  0x9b   : > { %v375_v26 = vadd.f32 %v374_v23, %v373_v17 }
  0x9c   : > { %381 = vadd.xlane.f32.xlu0 %v380_v20  ;;  %v400_v24 = vsel %vm398_vm4, %v367_v21, 0.0 }
  0x9d   : > { %v401_v29 = vadd.f32 %v400_v24, %v399_v22 }
  0x9f   : > { %402 = vadd.xlane.f32.xlu1 %v401_v29 }
  0xa0   : > { %376 = vadd.xlane.f32.xlu0 %v375_v26 }
  0xa3   : > { %407 = vadd.xlane.f32.xlu1 %v406_v30 }
  0xa4   : > { %388 = vadd.xlane.f32.xlu0 %v387_v31 }
 0x129   : > { %v382_v32 = vpop.xlane.xlu0 %381 }
 0x12c   : > { %v403_v33 = vpop.xlane.xlu1 %402 }
 0x12d   : > { %v377_v34 = vpop.xlane.xlu0 %376 }
 0x12e   : > { %v392_v38 = vsel %vm391_vm7, %v377_v34, %v382_v32 }
 0x130   : > { %v408_v36 = vpop.xlane.xlu1 %407 }
 0x131   : > { %v410_v39 = vsel %vm391_vm7, %v403_v33, %v408_v36  ;;  %v389_v40 = vpop.xlane.xlu0 %388 }
 0x132   : > { %v411_v41 = vadd.f32 %v410_v39, %v409_v35  ;;  %v394_v42 = vsel %vm393_vm8, %v392_v38, %v389_v40 }
 0x133   : > { %v395_v43 = vadd.f32 %v394_v42, %v390_v37 }
 0x134   : > { %413 = vst.msk [vmem:[%s250_s29] sm:$0x1] %vm263_vm5, %v411_v41 }
 0x135   : > { %397 = vst.msk [vmem:[%s256_s18] sm:$0xf] %vm261_vm6, %v395_v43 }
 0x136   : > { %733 = shalt.err (!%p730_p9)
}
 0x137   : > { %s734_s23 = scalar_lea.hbm %s1052_s8, 16  ;;  %s738_s29 = scalar_lea.hbm %s1106_s3, 32 }
 0x138   : > { %p735_p11 = scmp.ne.s32.totalorder %s1052_s8, %s734_s23  ;;  %p739_p13 = scmp.lt.u32.totalorder %s1052_s8, %s1106_s3 }
 0x139   : > { %p740_p5 = scmp.lt.u32.totalorder %s738_s29, %s734_s23  ;;  %p742_p0 = scmp.lt.u32.totalorder %s734_s23, %s1052_s8 }
 0x13a   : > { %p736_p3 = pnand %p735_p11, %p1119_p7 }
 0x13b   : > { %p741_p8 = por %p740_p5, %p739_p13 }
 0x13c   : > { %p737_p6 = pneg %p736_p3 }
 0x13d   : > { %p743_p4 = por %p742_p0, %p741_p8 }
 0x13f   : > { %p744_p10 = pnand %p743_p4, %p737_p6 }
 0x141   : > { %747 = shalt.err (!%p744_p10)
}
 0x142   : > { %585 = dma.vmem_to_hbm [thread:$0]  (%p1119_p7), %s1054_s11, 16, %s1052_s8, %s419_s15  }
 0x143 PF: > { %s453_s5 = sand.u32 1, %s786_s12   ;;  %p1120_p12 = scmp.ne.s32.totalorder %s1112_s27, 0 }
 0x144   : > { %p1121_p1 = scmp.ge.s32.totalorder %s806_s17, 2  ;;  %s454_s18 = scalar_lea.sflag [#allocation4], %s453_s5 }
 0x146   : > { %p595_p2 = pnand %p1121_p1, %p1120_p12 }
 0x148   : > { %781 = dma.done.wait (!%p595_p2), %s454_s18, 16  }
 0x149   : > { %783 = vsyncadd (!%p595_p2), %s454_s18, 4294967280  ;;  %s23_s17 = sadd.s32 1, %s806_s17   ;;  %s1122_s12 = smov %s790_s13 }
 0x14a   : > { %p20_p9 = scmp.ge.s32.totalorder %s23_s17, 4   ;;  %s1123_s13 = smov %s794_s14 }
 0x14b   : > { %s1124_s14 = smov %s888_s26  ;;  %s1125_s15 = smov %s802_s16 }
 0x14c   : > { %s1126_s16 = smov %s1128_s20  ;;  %22 = sbr.rel (!%p20_p9) target bundleno = 8 (0x8), region = 102 }
 0x153   :  { %458 = vsyncpa [#allocation3], 1 }
 0x154   :  { %460 = vsyncpa [#allocation3 + $0x1], 1 }
 0x155   :  { %461 = vsyncpa [#allocation6], 1 }
 0x156   :  { %463 = vsyncpa [#allocation6 + $0x1], 1 }
 0x157   :  { %464 = vsyncpa [#allocation4], 1 }
 0x158   :  { %466 = vsyncpa [#allocation4 + $0x1], 1 }

</bundles_post_ra>
